<compile_context>
chip_gen: v6e
topology: v6e:2x2x1
jax: 0.10.0
libtpu: 0.0.40
codegen_flags: <defaults>
</compile_context>

<pallas_src>
import jax
import jax.numpy as jnp
from jax.experimental import pallas as pl
from jax.experimental.pallas import tpu as pltpu

LANE = 128      # lane width for padded hidden dims
SUBLANE = 8     # f32 sublane multiple for the batch tile


def _round_up(x, m):
    return ((x + m - 1) // m) * m


def dqn_mlp_kernel(x_ref, w1_ref, b1_ref, w2_ref, b2_ref, w3_ref, b3_ref, out_ref):
    """Fused 3-layer MLP for one batch tile. Weights/biases are VMEM-resident."""
    x = x_ref[...].astype(jnp.bfloat16)                              # cast after load

    # fc1 + ReLU  (bf16 MXU operands, f32 accumulate / elementwise)
    h1 = jnp.dot(x, w1_ref[...], preferred_element_type=jnp.float32) + b1_ref[...]
    h1 = jnp.maximum(h1, 0.0).astype(jnp.bfloat16)

    # fc2 + ReLU
    h2 = jnp.dot(h1, w2_ref[...], preferred_element_type=jnp.float32) + b2_ref[...]
    h2 = jnp.maximum(h2, 0.0).astype(jnp.bfloat16)

    # fc3 (Q-values, no activation) — store exactly n_actions columns
    q = jnp.dot(h2, w3_ref[...], preferred_element_type=jnp.float32) + b3_ref[...]
    out_ref[...] = q.astype(out_ref.dtype)


def _pad2d(a, rows, cols):
    return jnp.pad(a, ((0, rows - a.shape[0]), (0, cols - a.shape[1])))


def prepare_params(w1, b1, w2, b2, w3, b3):
    """One-time preprocessing (call OUTSIDE the training loop / jit).

    Zero-pads hidden widths to 128 lanes (padded activation columns stay exactly
    0 through ReLU), keeps the output width at n_actions, and casts matmul
    operands to bf16 (biases stay f32).
    """
    n_in, f1 = w1.shape
    f2 = w2.shape[1]
    n_actions = w3.shape[1]
    F1 = _round_up(f1, LANE)
    F2 = _round_up(f2, LANE)

    w1p = _pad2d(w1, n_in, F1).astype(jnp.bfloat16)
    w2p = _pad2d(w2, F1, F2).astype(jnp.bfloat16)
    w3p = _pad2d(w3, F2, n_actions).astype(jnp.bfloat16)
    b1p = _pad2d(b1, 1, F1).astype(jnp.float32)
    b2p = _pad2d(b2, 1, F2).astype(jnp.float32)
    b3p = b3.astype(jnp.float32)
    return (w1p, b1p, w2p, b2p, w3p, b3p)


def dqn_forward(x, params, *, block_batch=1024):
    """Forward pass of the DQN.

    x:      [B, n_inputs] float32
    params: output of prepare_params() (pre-padded bf16 weights, f32 biases)
    Returns [B, n_actions] float32.
    """
    w1p, b1p, w2p, b2p, w3p, b3p = params
    B, n_in = x.shape
    F1 = w1p.shape[1]
    F2 = w2p.shape[1]
    A = w3p.shape[1]

    # Batch tile: >= 2 grid steps when B is large enough (v7x megacore sharding),
    # multiple of 8 sublanes, capped at block_batch to bound VMEM.
    TB = min(block_batch, _round_up(pl.cdiv(B, 2), SUBLANE))
    Bp = _round_up(B, TB)
    xp = x if Bp == B else jnp.pad(x, ((0, Bp - B), (0, 0)))

    grid = (Bp // TB,)

    cost = pl.CostEstimate(
        flops=2 * Bp * (n_in * F1 + F1 * F2 + F2 * A),
        transcendentals=0,
        bytes_accessed=(
            Bp * n_in * 4                                        # x (f32)
            + (w1p.size + w2p.size + w3p.size) * 2               # weights (bf16)
            + (b1p.size + b2p.size + b3p.size) * 4               # biases (f32)
            + Bp * A * 4                                         # Q out (f32)
        ),
    )

    q_padded = pl.pallas_call(
        dqn_mlp_kernel,
        out_shape=jax.ShapeDtypeStruct((Bp, A), jnp.float32),
        grid_spec=pltpu.PrefetchScalarGridSpec(
            num_scalar_prefetch=0,
            grid=grid,
            in_specs=[
                pl.BlockSpec((TB, n_in), lambda i: (i, 0)),   # x: tiled over batch
                pl.BlockSpec((n_in, F1), lambda i: (0, 0)),   # w1: VMEM-resident
                pl.BlockSpec((1, F1), lambda i: (0, 0)),      # b1
                pl.BlockSpec((F1, F2), lambda i: (0, 0)),     # w2
                pl.BlockSpec((1, F2), lambda i: (0, 0)),      # b2
                pl.BlockSpec((F2, A), lambda i: (0, 0)),      # w3
                pl.BlockSpec((1, A), lambda i: (0, 0)),       # b3
            ],
            out_specs=pl.BlockSpec((TB, A), lambda i: (i, 0)),  # exact n_actions wide
        ),
        compiler_params=pltpu.CompilerParams(
            dimension_semantics=("parallel",),  # v7x: shard batch tiles across 2 TCs
        ),
        cost_estimate=cost,
    )(xp, w1p, b1p, w2p, b2p, w3p, b3p)

    # Strip batch padding only (no column slice needed anymore).
    return q_padded if Bp == B else q_padded[:B]


dqn_forward_jit = jax.jit(dqn_forward, static_argnames=("block_batch",))


def init_linear(key, fan_in, fan_out):
    """Mirror nn.Linear's default U(-1/sqrt(fan_in), 1/sqrt(fan_in)) init.

    Weight is stored transposed relative to PyTorch: [fan_in, fan_out].
    """
    kw, kb = jax.random.split(key)
    bound = 1.0 / jnp.sqrt(float(fan_in))
    w = jax.random.uniform(kw, (fan_in, fan_out), jnp.float32, -bound, bound)
    b = jax.random.uniform(kb, (1, fan_out), jnp.float32, -bound, bound)
    return w, b


def reference_forward_f32(x, w1, b1, w2, b2, w3, b3):
    h1 = jnp.maximum(x @ w1 + b1, 0.0)
    h2 = jnp.maximum(h1 @ w2 + b2, 0.0)
    return h2 @ w3 + b3


def reference_forward_bf16(x, w1, b1, w2, b2, w3, b3):
    """Reference matching the kernel's numerics (bf16 operands, f32 accumulate)."""
    bf = jnp.bfloat16
    h1 = jnp.maximum(
        jnp.dot(x.astype(bf), w1.astype(bf), preferred_element_type=jnp.float32) + b1, 0.0)
    h2 = jnp.maximum(
        jnp.dot(h1.astype(bf), w2.astype(bf), preferred_element_type=jnp.float32) + b2, 0.0)
    return jnp.dot(h2.astype(bf), w3.astype(bf), preferred_element_type=jnp.float32) + b3


if __name__ == "__main__":
    # Small shapes consistent with the module: state -> fc1 -> fc2 -> actions.
    batch = 4
    n_inputs = 16
    fc1_dims = 64
    fc2_dims = 32
    n_actions = 8

    root = jax.random.PRNGKey(0)
    k_x, k1, k2, k3 = jax.random.split(root, 4)

    x = jax.random.normal(k_x, (batch, n_inputs), jnp.float32)
    w1, b1 = init_linear(k1, n_inputs, fc1_dims)
    w2, b2 = init_linear(k2, fc1_dims, fc2_dims)
    w3, b3 = init_linear(k3, fc2_dims, n_actions)

    # One-time preprocessing (hoisted out of the per-step forward).
    params = prepare_params(w1, b1, w2, b2, w3, b3)
    params = jax.tree_util.tree_map(jax.block_until_ready, params)

    q = dqn_forward_jit(x, params)
    q = jax.block_until_ready(q)

    assert q.shape == (batch, n_actions), q.shape

    # Tight check against a reference with matching (bf16-operand) numerics.
    q_ref_bf16 = reference_forward_bf16(x, w1, b1, w2, b2, w3, b3)
    assert jnp.allclose(q, q_ref_bf16, atol=1e-3, rtol=1e-3), \
        "mismatch vs. bf16-numerics reference"

    # Loose check against the full-f32 reference (bf16 operand rounding only).
    # TODO(synk): if Q-value precision matters for TD targets, gate the bf16 cast
    # behind a flag and run the MXU in f32.
    q_ref_f32 = reference_forward_f32(x, w1, b1, w2, b2, w3, b3)
    assert jnp.allclose(q, q_ref_f32, atol=5e-2, rtol=5e-2), \
        "mismatch vs. f32 reference"

    print("KERNEL_OK")
</pallas_src>

<mosaic_0001>
module attributes {stable_mosaic.version = 11 : i64} {
  func.func @dqn_mlp_kernel(%arg0: i32, %arg1: memref<8x16xf32, #tpu.memory_space<vmem>>, %arg2: memref<16x128xbf16, #tpu.memory_space<vmem>>, %arg3: memref<1x128xf32, #tpu.memory_space<vmem>>, %arg4: memref<128x128xbf16, #tpu.memory_space<vmem>>, %arg5: memref<1x128xf32, #tpu.memory_space<vmem>>, %arg6: memref<128x8xbf16, #tpu.memory_space<vmem>>, %arg7: memref<1x8xf32, #tpu.memory_space<vmem>>, %arg8: memref<8x8xf32, #tpu.memory_space<vmem>>) attributes {dimension_semantics = [#tpu.dimension_semantics<parallel>], iteration_bounds = array<i64: 1>, scalar_prefetch = 0 : i64, scratch_operands = 0 : i64, tpu.core_type = #tpu.core_type<tc>, window_params = [{transform_indices = @transform_0, window_bounds = array<i64: 8, 16>}, {pipeline_mode = #tpu.pipeline_mode<synchronous>, transform_indices = @transform_1, window_bounds = array<i64: 16, 128>}, {pipeline_mode = #tpu.pipeline_mode<synchronous>, transform_indices = @transform_2, window_bounds = array<i64: 1, 128>}, {pipeline_mode = #tpu.pipeline_mode<synchronous>, transform_indices = @transform_3, window_bounds = array<i64: 128, 128>}, {pipeline_mode = #tpu.pipeline_mode<synchronous>, transform_indices = @transform_4, window_bounds = array<i64: 1, 128>}, {pipeline_mode = #tpu.pipeline_mode<synchronous>, transform_indices = @transform_5, window_bounds = array<i64: 128, 8>}, {pipeline_mode = #tpu.pipeline_mode<synchronous>, transform_indices = @transform_6, window_bounds = array<i64: 1, 8>}, {transform_indices = @transform_7, window_bounds = array<i64: 8, 8>}]} {
    %c0 = arith.constant 0 : index
    %c0_0 = arith.constant 0 : index
    %0 = vector.load %arg1[%c0, %c0_0] : memref<8x16xf32, #tpu.memory_space<vmem>>, vector<8x16xf32>
    %1 = arith.truncf %0 : vector<8x16xf32> to vector<8x16xbf16>
    %c0_1 = arith.constant 0 : index
    %c0_2 = arith.constant 0 : index
    %2 = vector.load %arg2[%c0_1, %c0_2] : memref<16x128xbf16, #tpu.memory_space<vmem>>, vector<16x128xbf16>
    %cst = arith.constant dense<0.000000e+00> : vector<8x128xf32>
    %3 = tpu.matmul %1, %2, %cst {dimension_numbers = #tpu.dot_dimension_numbers<[1], [0], [0], [1], [0, 0, 1, 1], [], []>} : vector<8x16xbf16>, vector<16x128xbf16>, vector<8x128xf32> -> vector<8x128xf32>
    %c0_3 = arith.constant 0 : index
    %c0_4 = arith.constant 0 : index
    %4 = vector.load %arg3[%c0_3, %c0_4] : memref<1x128xf32, #tpu.memory_space<vmem>>, vector<1x128xf32>
    %5 = vector.broadcast %4 : vector<1x128xf32> to vector<8x128xf32>
    %6 = arith.addf %3, %5 : vector<8x128xf32>
    %cst_5 = arith.constant 0.000000e+00 : f32
    %7 = vector.broadcast %cst_5 : f32 to vector<8x128xf32>
    %8 = arith.maximumf %6, %7 : vector<8x128xf32>
    %9 = arith.truncf %8 : vector<8x128xf32> to vector<8x128xbf16>
    %c0_6 = arith.constant 0 : index
    %c0_7 = arith.constant 0 : index
    %10 = vector.load %arg4[%c0_6, %c0_7] : memref<128x128xbf16, #tpu.memory_space<vmem>>, vector<128x128xbf16>
    %cst_8 = arith.constant dense<0.000000e+00> : vector<8x128xf32>
    %11 = tpu.matmul %9, %10, %cst_8 {dimension_numbers = #tpu.dot_dimension_numbers<[1], [0], [0], [1], [0, 0, 1, 1], [], []>} : vector<8x128xbf16>, vector<128x128xbf16>, vector<8x128xf32> -> vector<8x128xf32>
    %c0_9 = arith.constant 0 : index
    %c0_10 = arith.constant 0 : index
    %12 = vector.load %arg5[%c0_9, %c0_10] : memref<1x128xf32, #tpu.memory_space<vmem>>, vector<1x128xf32>
    %13 = vector.broadcast %12 : vector<1x128xf32> to vector<8x128xf32>
    %14 = arith.addf %11, %13 : vector<8x128xf32>
    %cst_11 = arith.constant 0.000000e+00 : f32
    %15 = vector.broadcast %cst_11 : f32 to vector<8x128xf32>
    %16 = arith.maximumf %14, %15 : vector<8x128xf32>
    %17 = arith.truncf %16 : vector<8x128xf32> to vector<8x128xbf16>
    %c0_12 = arith.constant 0 : index
    %c0_13 = arith.constant 0 : index
    %18 = vector.load %arg6[%c0_12, %c0_13] : memref<128x8xbf16, #tpu.memory_space<vmem>>, vector<128x8xbf16>
    %cst_14 = arith.constant dense<0.000000e+00> : vector<8x8xf32>
    %19 = tpu.matmul %17, %18, %cst_14 {dimension_numbers = #tpu.dot_dimension_numbers<[1], [0], [0], [1], [0, 0, 1, 1], [], []>} : vector<8x128xbf16>, vector<128x8xbf16>, vector<8x8xf32> -> vector<8x8xf32>
    %c0_15 = arith.constant 0 : index
    %c0_16 = arith.constant 0 : index
    %20 = vector.load %arg7[%c0_15, %c0_16] : memref<1x8xf32, #tpu.memory_space<vmem>>, vector<1x8xf32>
    %21 = vector.broadcast %20 : vector<1x8xf32> to vector<8x8xf32>
    %22 = arith.addf %19, %21 : vector<8x8xf32>
    %c0_17 = arith.constant 0 : index
    %c0_18 = arith.constant 0 : index
    %23 = vector.load %arg8[%c0_17, %c0_18] : memref<8x8xf32, #tpu.memory_space<vmem>>, vector<8x8xf32>
    tpu.vector_store %arg8[%c0_17, %c0_18], %22 {strides = array<i32>} : memref<8x8xf32, #tpu.memory_space<vmem>>, vector<8x8xf32>,
    return
  }
  func.func @transform_0(%arg0: i32) -> (i32, i32) {
    %c0_i32 = arith.constant 0 : i32
    %c0_i32_0 = arith.constant 0 : i32
    return %arg0, %c0_i32 : i32, i32
  }
  func.func @transform_1(%arg0: i32) -> (i32, i32) {
    %c0_i32 = arith.constant 0 : i32
    %c0_i32_0 = arith.constant 0 : i32
    %c0_i32_1 = arith.constant 0 : i32
    return %c0_i32, %c0_i32_0 : i32, i32
  }
  func.func @transform_2(%arg0: i32) -> (i32, i32) {
    %c0_i32 = arith.constant 0 : i32
    %c0_i32_0 = arith.constant 0 : i32
    %c0_i32_1 = arith.constant 0 : i32
    return %c0_i32, %c0_i32_0 : i32, i32
  }
  func.func @transform_3(%arg0: i32) -> (i32, i32) {
    %c0_i32 = arith.constant 0 : i32
    %c0_i32_0 = arith.constant 0 : i32
    %c0_i32_1 = arith.constant 0 : i32
    return %c0_i32, %c0_i32_0 : i32, i32
  }
  func.func @transform_4(%arg0: i32) -> (i32, i32) {
    %c0_i32 = arith.constant 0 : i32
    %c0_i32_0 = arith.constant 0 : i32
    %c0_i32_1 = arith.constant 0 : i32
    return %c0_i32, %c0_i32_0 : i32, i32
  }
  func.func @transform_5(%arg0: i32) -> (i32, i32) {
    %c0_i32 = arith.constant 0 : i32
    %c0_i32_0 = arith.constant 0 : i32
    %c0_i32_1 = arith.constant 0 : i32
    return %c0_i32, %c0_i32_0 : i32, i32
  }
  func.func @transform_6(%arg0: i32) -> (i32, i32) {
    %c0_i32 = arith.constant 0 : i32
    %c0_i32_0 = arith.constant 0 : i32
    %c0_i32_1 = arith.constant 0 : i32
    return %c0_i32, %c0_i32_0 : i32, i32
  }
  func.func @transform_7(%arg0: i32) -> (i32, i32) {
    %c0_i32 = arith.constant 0 : i32
    %c0_i32_0 = arith.constant 0 : i32
    return %arg0, %c0_i32 : i32, i32
  }
}

</mosaic_0001>

<bundles_post_ra>
// kernel: dqn_forward.1
= control target key start
LH: loop header
LB: loop body
LE: loop exit
PB: predicated region body
PF: predicated region fallthrough
CT: control target
= control target key end

     0   :  { %v426_v0 = vmov 0.0   ;;  %vm427_vm0 = vmmov 0   ;;  %vm44_vm1 = vcmask 130048   ;;  %vm314_vm2 = vcmask 64512   ;;  %s554_s1 = inlined_call_operand.vmem [shape: bf16[16,128], index: 1, kind: input, shape index: {}]   ;;  %s555_s0 = inlined_call_operand.vmem [shape: f32[8,16], index: 0, kind: input, shape index: {}]   ;;  %s556_s3 = inlined_call_operand.vmem [shape: bf16[128,128], index: 3, kind: input, shape index: {}]   ;;  %s557_s5 = inlined_call_operand.vmem [shape: bf16[128,8], index: 5, kind: input, shape index: {}]   ;;  %s558_s2 = inlined_call_operand.vmem [shape: f32[1,128], index: 2, kind: input, shape index: {}]   ;;  %s559_s4 = inlined_call_operand.vmem [shape: f32[1,128], index: 4, kind: input, shape index: {}]   ;;  %s560_s6 = inlined_call_operand.vmem [shape: f32[1,8], index: 6, kind: input, shape index: {}]   ;;  %s561_s7 = inlined_call_operand.vmem [shape: f32[8,8], index: 7, kind: output, shape index: {}]  }
   0x1   :  { %361 = vmatprep.subr.bf16.mxu0 %v426_v0  ;;  %v409_v1 = vld [vmem:[%s554_s1] sm:$0xff]   ;;  %363 = vmatprep.mubr.msk.bf16.mxu0 %vm427_vm0, %v426_v0  ;;  %v410_v4 = vld [vmem:[%s556_s3 + $0x38] sm:$0xff]   ;;  %v411_v5 = vld [vmem:[%s556_s3 + $0x30] sm:$0xff]  }
   0x2   :  { %v27_v2 = vld [vmem:[%s555_s0] sm:$0xff]  ;;  %367 = vmatprep.subr.bf16.mxu1 %v426_v0  ;;  %383 = vmatprep.mubr.msk.bf16.mxu1 %vm427_vm0, %v426_v0  ;;  %v412_v6 = vld [vmem:[%s556_s3 + $0x28] sm:$0xff]   ;;  %v414_v8 = vld [vmem:[%s556_s3 + $0x18] sm:$0xff]  }
   0x3   :  { %362 = vmatpush3.bf16.msra.mxu0 %v409_v1  ;;  %v28_v3 = vpack.c.bf16 %v27_v2, %v27_v2  ;;  %368 = vmatpush3.bf16.msra.mxu1 %v410_v4  ;;  %v413_v7 = vld [vmem:[%s556_s3 + $0x20] sm:$0xff]   ;;  %v415_v9 = vld [vmem:[%s556_s3 + $0x10] sm:$0xff]   ;;  %v416_v10 = vld [vmem:[%s556_s3 + $0x8] sm:$0xff]  }
   0x4   :  { %387 = vmatprep.subr.bf16.mxu0 %v426_v0  ;;  %369 = vmatprep.subr.bf16.mxu1 %v426_v0  ;;  %v417_v11 = vld [vmem:[%s556_s3] sm:$0xff]   ;;  %v418_v12 = vld [vmem:[%s557_s5 + $0x38] sm:$0xff]   ;;  %v419_v13 = vld [vmem:[%s557_s5 + $0x30] sm:$0xff]  }
   0x5   :  { %v420_v14 = vld [vmem:[%s557_s5 + $0x28] sm:$0xff]   ;;  %v421_v15 = vld [vmem:[%s557_s5 + $0x20] sm:$0xff]   ;;  %v422_v16 = vld [vmem:[%s557_s5 + $0x18] sm:$0xff]  }
   0x6   :  { %364 = vmatmul.mubr.msk.bf16.vlgmr.msra.gmra.mxu0 %vm44_vm1, %v28_v3  ;;  %v423_v17 = vld [vmem:[%s557_s5 + $0x10] sm:$0xff]   ;;  %v320_v18 = vld [vmem:[%s558_s2] ss:$0 sm:$0xff]  ;;  %v424_v26 = vld [vmem:[%s557_s5 + $0x8] sm:$0xff]  }
   0x7   :  { %403 = vmatprep.mubr.msk.bf16.mxu0 %vm427_vm0, %v426_v0  ;;  %370 = vmatpush3.bf16.msra.mxu1 %v411_v5  ;;  %v425_v27 = vld [vmem:[%s557_s5] sm:$0xff]  }
   0x8   :  { %371 = vmatprep.subr.bf16.mxu1 %v426_v0  ;;  %388 = vmatpush3.bf16.msra.mxu0 %v418_v12  ;;  %v323_v28 = vld [vmem:[%s559_s4] ss:$0 sm:$0xff] }
   0x9   :  { %389 = vmatprep.subr.bf16.mxu0 %v426_v0  ;;  %v332_v36 = vld [vmem:[%s560_s6] ss:$0 sm:$0xff] }
   0xb   :  { %372 = vmatpush3.bf16.msra.mxu1 %v412_v6 }
   0xc   :  { %373 = vmatprep.subr.bf16.mxu1 %v426_v0  ;;  %390 = vmatpush3.bf16.msra.mxu0 %v419_v13 }
   0xd   :  { %391 = vmatprep.subr.bf16.mxu0 %v426_v0 }
   0xf   :  { %374 = vmatpush3.bf16.msra.mxu1 %v413_v7 }
  0x10   :  { %375 = vmatprep.subr.bf16.mxu1 %v426_v0  ;;  %392 = vmatpush3.bf16.msra.mxu0 %v420_v14 }
  0x11   :  { %393 = vmatprep.subr.bf16.mxu0 %v426_v0 }
  0x13   :  { %376 = vmatpush3.bf16.msra.mxu1 %v414_v8 }
  0x14   :  { %377 = vmatprep.subr.bf16.mxu1 %v426_v0  ;;  %394 = vmatpush3.bf16.msra.mxu0 %v421_v15 }
  0x15   :  { %395 = vmatprep.subr.bf16.mxu0 %v426_v0 }
  0x17   :  { %378 = vmatpush3.bf16.msra.mxu1 %v415_v9 }
  0x18   :  { %379 = vmatprep.subr.bf16.mxu1 %v426_v0  ;;  %396 = vmatpush3.bf16.msra.mxu0 %v422_v16 }
  0x19   :  { %397 = vmatprep.subr.bf16.mxu0 %v426_v0 }
  0x1b   :  { %380 = vmatpush3.bf16.msra.mxu1 %v416_v10 }
  0x1c   :  { %381 = vmatprep.subr.bf16.mxu1 %v426_v0  ;;  %398 = vmatpush3.bf16.msra.mxu0 %v423_v17 }
  0x1d   :  { %399 = vmatprep.subr.bf16.mxu0 %v426_v0 }
  0x1f   :  { %382 = vmatpush3.bf16.msra.mxu1 %v417_v11 }
  0x20   :  { %400 = vmatpush3.bf16.msra.mxu0 %v424_v26 }
  0x21   :  { %401 = vmatprep.subr.bf16.mxu0 %v426_v0 }
  0x24   :  { %402 = vmatpush3.bf16.msra.mxu0 %v425_v27 }
  0xc6   :  { %v82_v19 = vpop.f32.mrf.mxu0 }
  0xc7   :  { %v83_v20 = vadd.f32 %v320_v18, %v82_v19 }
  0xc8   :  { %v365_v21 = vpop.f32.mrf.mxu0 }
  0xc9   :  { %v88_v22 = vmax.f32 %v83_v20, 0.0 }
  0xca   :  { %v85_v23 = vpop.f32.mrf.mxu0 }
  0xcb   :  { %v89_v24 = vpack.c.bf16 %v88_v22, %v88_v22 }
  0xcc   :  { %v366_v25 = vpop.f32.mrf.mxu0 }
  0xcd   :  { %384 = vmatmul.mubr.bf16.vlgmr.msra.gmra.mxu1 %v89_v24 }
 0x18d   :  { %v195_v29 = vpop.f32.mrf.mxu1 }
 0x18e   :  { %v196_v30 = vadd.f32 %v323_v28, %v195_v29 }
 0x18f   :  { %v385_v31 = vpop.f32.mrf.mxu1 }
 0x190   :  { %v201_v32 = vmax.f32 %v196_v30, 0.0 }
 0x191   :  { %v198_v33 = vpop.f32.mrf.mxu1 }
 0x192   :  { %v202_v34 = vpack.c.bf16 %v201_v32, %v201_v32 }
 0x193   :  { %v386_v35 = vpop.f32.mrf.mxu1 }
 0x194   :  { %404 = vmatmul.mubr.bf16.vlgmr.msra.gmra.mxu0 %v202_v34 }
 0x254   :  { %v308_v37 = vpop.f32.mrf.mxu0 }
 0x255   :  { %v309_v38 = vadd.f32 %v332_v36, %v308_v37 }
 0x256   :  { %v405_v39 = vpop.f32.mrf.mxu0 }
 0x257   :  { %315 = vst.msk [vmem:[%s561_s7] sm:$0xff] %vm314_vm2, %v309_v38 }
 0x258   :  { %v311_v40 = vpop.f32.mrf.mxu0 }
 0x25a   :  { %v406_v41 = vpop.f32.mrf.mxu0 }

</bundles_post_ra>
